<compile_context>
chip_gen: v5e
topology: v5e:2x2
jax: 0.10.0
libtpu: 0.0.40
codegen_flags: <defaults>
</compile_context>

<pallas_src>
import functools

import jax
import jax.numpy as jnp
from jax.experimental import pallas as pl
from jax.experimental.pallas import tpu as pltpu

_BF16 = jnp.bfloat16
# 4096 rows/tile: double-buffered x tile + bf16 out tile + resident weights
# stay well under the 32 MiB scoped VMEM default (16 MiB on v5e), while the
# ~0.35 us per-grid-step overhead drops to a few percent of each step.
_MAX_BATCH_TILE = 4096


def _round_up(n, m):
    return ((n + m - 1) // m) * m


def _cdiv(a, b):
    return -(-a // b)


def _policy_kernel(x_ref,
                   w1_ref, b1_ref,
                   w2_ref, b2_ref,
                   wh_ref, bh_ref,
                   out_ref, *, action_dim):
    x = x_ref[...].astype(_BF16)

    # Hidden layer 1: bf16 operands on MXU, f32 accumulate; cast the
    # pre-activation to bf16 BEFORE tanh (bf16 EUP on v6e/v7x, and the next
    # matmul consumes the bf16 activation directly).
    z1 = jnp.dot(x, w1_ref[...], preferred_element_type=jnp.float32) + b1_ref[...]
    h1 = jnp.tanh(z1.astype(_BF16))

    # Hidden layer 2.
    z2 = jnp.dot(h1, w2_ref[...], preferred_element_type=jnp.float32) + b2_ref[...]
    h2 = jnp.tanh(z2.astype(_BF16))

    # Fused heads: lanes [0:AD] = action_mean, lane AD = raw log-std logit,
    # remaining lanes are zero (wh/bh zero padded).
    head = (jnp.dot(h2, wh_ref[...], preferred_element_type=jnp.float32)
            + bh_ref[...])                                # [tb, OUT_W] f32

    # Transcendentals on the narrow [tb, 1] column only.
    raw = head[:, action_dim:action_dim + 1]              # [tb, 1]
    log_std_n = jax.nn.sigmoid(raw) * (-2.3)              # [tb, 1]
    std_n = jnp.exp(log_std_n)                            # [tb, 1]

    tb, out_w = out_ref.shape
    lane = jax.lax.broadcasted_iota(jnp.int32, (tb, out_w), 1)
    log_std_f = jnp.broadcast_to(log_std_n, (tb, out_w))
    std_f = jnp.broadcast_to(std_n, (tb, out_w))

    # Lane-dense slab: mean | log_std | std | (don't care).  Lanes >= 3*AD are
    # never read by the wrapper, so no zeroing select / zeros broadcast needed.
    slab = jnp.where(
        lane < action_dim, head,
        jnp.where(lane < 2 * action_dim, log_std_f, std_f))
    out_ref[...] = slab.astype(out_ref.dtype)              # bf16 store


@functools.partial(jax.jit, static_argnames=("action_dim",))
def policy_forward(x, kp, *, action_dim):
    """x: [B, state_dim] float32. kp: fused kernel params (see prepare_params)."""
    B, S = x.shape
    H1 = kp["w1"].shape[1]
    H2 = kp["w2"].shape[1]
    out_w = kp["wh"].shape[1]

    # Batch-tile choice:
    #  * cap at _MAX_BATCH_TILE rows,
    #  * force >=2 (and even) blocks whenever B allows so v7x's two
    #    TensorCores split the "parallel" batch axis evenly,
    #  * no jnp.pad copy of x: the ragged trailing block (if any) is handled
    #    by Pallas's clamped DMAs (OOB reads unspecified, OOB writes dropped).
    b8 = _round_up(B, 8)
    n_blocks = _cdiv(b8, _MAX_BATCH_TILE)
    if n_blocks == 1 and b8 >= 16:
        n_blocks = 2
    elif n_blocks > 1 and n_blocks % 2 == 1:
        n_blocks += 1
    tb = max(8, _round_up(_cdiv(b8, n_blocks), 8))
    grid = (_cdiv(B, tb),)

    def weight_spec(a):
        # Full array, same block every grid step -> stays resident in VMEM.
        # (pl.Buffered(1) single-buffering would shave ~80 KB of VMEM; skipped
        #  since it is not a wall-clock lever at this size.)
        return pl.BlockSpec(a.shape, lambda i: (0, 0))

    in_specs = [
        pl.BlockSpec((tb, S), lambda i: (i, 0)),      # x tile streams with grid
        weight_spec(kp["w1"]), weight_spec(kp["b1"]),
        weight_spec(kp["w2"]), weight_spec(kp["b2"]),
        weight_spec(kp["wh"]), weight_spec(kp["bh"]),
    ]
    out_spec = pl.BlockSpec((tb, out_w), lambda i: (i, 0))

    flops = 2 * B * (S * H1 + H1 * H2 + H2 * out_w)
    transcendentals = B * (H1 + H2 + 2)
    bytes_accessed = (
        x.size * x.dtype.itemsize
        + sum(v.size * v.dtype.itemsize for v in kp.values())
        + B * out_w * 2   # bf16 output slab
    )

    slab = pl.pallas_call(
        functools.partial(_policy_kernel, action_dim=action_dim),
        out_shape=jax.ShapeDtypeStruct((B, out_w), _BF16),
        grid=grid,
        in_specs=in_specs,
        out_specs=out_spec,
        compiler_params=pltpu.CompilerParams(
            dimension_semantics=("parallel",)),
        cost_estimate=pl.CostEstimate(
            flops=flops,
            transcendentals=transcendentals,
            bytes_accessed=bytes_accessed),
    )(x, kp["w1"], kp["b1"], kp["w2"], kp["b2"], kp["wh"], kp["bh"])

    mean = slab[:, :action_dim].astype(jnp.float32)
    log_std = slab[:, action_dim:2 * action_dim].astype(jnp.float32)
    std = slab[:, 2 * action_dim:3 * action_dim].astype(jnp.float32)
    return mean, log_std, std


def init_params(key, state_dim, action_dim, hidden_size=(128, 128)):
    """Torch-like nn.Linear init (uniform +-1/sqrt(fan_in)) with the Policy
    scaling: head weights *0.1, head biases *0.  Weights stored as [in, out]."""
    keys = jax.random.split(key, 8)

    def linear(kw, kb, fan_in, fan_out):
        bound = 1.0 / jnp.sqrt(fan_in)
        w = jax.random.uniform(kw, (fan_in, fan_out), jnp.float32, -bound, bound)
        b = jax.random.uniform(kb, (1, fan_out), jnp.float32, -bound, bound)
        return w, b

    h1, h2 = hidden_size
    w1, b1 = linear(keys[0], keys[1], state_dim, h1)
    w2, b2 = linear(keys[2], keys[3], h1, h2)
    wm, bm = linear(keys[4], keys[5], h2, action_dim)
    wm = wm * 0.1
    bm = bm * 0.0
    wls, bls = linear(keys[6], keys[7], h2, 1)
    wls = wls * 0.1
    bls = bls * 0.0
    return dict(w1=w1, b1=b1, w2=w2, b2=b2, wm=wm, bm=bm, wls=wls, bls=bls)


def prepare_params(params, action_dim):
    """Fuse the two heads into one lane-dense weight and cast matmul weights to bf16."""
    h2 = params["w2"].shape[1]
    out_w = _round_up(max(3 * action_dim, action_dim + 1), 128)

    wh = jnp.zeros((h2, out_w), jnp.float32)
    wh = wh.at[:, :action_dim].set(params["wm"])
    wh = wh.at[:, action_dim:action_dim + 1].set(params["wls"])
    bh = jnp.zeros((1, out_w), jnp.float32)
    bh = bh.at[:, :action_dim].set(params["bm"])
    bh = bh.at[:, action_dim:action_dim + 1].set(params["bls"])

    return dict(
        w1=params["w1"].astype(_BF16), b1=params["b1"],
        w2=params["w2"].astype(_BF16), b2=params["b2"],
        wh=wh.astype(_BF16), bh=bh,
    )


def _reference_forward(x, kp, action_dim):
    """Plain-JAX reference matching the kernel's numerics: bf16 weights, f32
    accumulation, bf16 pre-activation before tanh, bf16 output rounding."""
    f32 = lambda a: a.astype(jnp.float32)
    bf = lambda a: a.astype(_BF16)

    z1 = f32(bf(x)) @ f32(kp["w1"]) + kp["b1"]
    h1 = bf(jnp.tanh(f32(bf(z1))))
    z2 = f32(h1) @ f32(kp["w2"]) + kp["b2"]
    h2 = bf(jnp.tanh(f32(bf(z2))))
    head = f32(h2) @ f32(kp["wh"]) + kp["bh"]

    mean = head[:, :action_dim]
    raw = head[:, action_dim:action_dim + 1]
    log_std = jnp.broadcast_to(jax.nn.sigmoid(raw) * (-2.3), mean.shape)
    std = jnp.exp(log_std)

    # Emulate the bf16 output slab rounding.
    rnd = lambda a: f32(bf(a))
    return rnd(mean), rnd(log_std), rnd(std)


if __name__ == "__main__":
    key = jax.random.PRNGKey(0)
    k_x, k_p = jax.random.split(key)

    B, state_dim, action_dim = 8, 32, 4
    x = jax.random.normal(k_x, (B, state_dim), jnp.float32)
    raw_params = init_params(k_p, state_dim, action_dim, hidden_size=(128, 128))
    kp = prepare_params(raw_params, action_dim)

    mean, log_std, std = policy_forward(x, kp, action_dim=action_dim)
    jax.block_until_ready((mean, log_std, std))

    ref_mean, ref_log_std, ref_std = _reference_forward(x, kp, action_dim)
    assert mean.shape == (B, action_dim)
    assert log_std.shape == (B, action_dim)
    assert std.shape == (B, action_dim)
    # bf16 weights + bf16 output slab => ~1e-2 parity vs the matching reference.
    assert jnp.allclose(mean, ref_mean, atol=1e-2, rtol=1e-2)
    assert jnp.allclose(log_std, ref_log_std, atol=1e-2, rtol=1e-2)
    assert jnp.allclose(std, ref_std, atol=1e-2, rtol=1e-2)
    assert jnp.all(jnp.isfinite(mean)) and jnp.all(jnp.isfinite(std))

    print("KERNEL_OK")
</pallas_src>

<mosaic_0001>
module attributes {stable_mosaic.version = 11 : i64} {
  func.func @_policy_kernel(%arg0: i32, %arg1: memref<8x32xf32, #tpu.memory_space<vmem>>, %arg2: memref<32x128xbf16, #tpu.memory_space<vmem>>, %arg3: memref<1x128xf32, #tpu.memory_space<vmem>>, %arg4: memref<128x128xbf16, #tpu.memory_space<vmem>>, %arg5: memref<1x128xf32, #tpu.memory_space<vmem>>, %arg6: memref<128x128xbf16, #tpu.memory_space<vmem>>, %arg7: memref<1x128xf32, #tpu.memory_space<vmem>>, %arg8: memref<8x128xbf16, #tpu.memory_space<vmem>>) attributes {dimension_semantics = [#tpu.dimension_semantics<parallel>], iteration_bounds = array<i64: 1>, scalar_prefetch = 0 : i64, scratch_operands = 0 : i64, tpu.core_type = #tpu.core_type<tc>, window_params = [{transform_indices = @transform_0, window_bounds = array<i64: 8, 32>}, {pipeline_mode = #tpu.pipeline_mode<synchronous>, transform_indices = @transform_1, window_bounds = array<i64: 32, 128>}, {pipeline_mode = #tpu.pipeline_mode<synchronous>, transform_indices = @transform_2, window_bounds = array<i64: 1, 128>}, {pipeline_mode = #tpu.pipeline_mode<synchronous>, transform_indices = @transform_3, window_bounds = array<i64: 128, 128>}, {pipeline_mode = #tpu.pipeline_mode<synchronous>, transform_indices = @transform_4, window_bounds = array<i64: 1, 128>}, {pipeline_mode = #tpu.pipeline_mode<synchronous>, transform_indices = @transform_5, window_bounds = array<i64: 128, 128>}, {pipeline_mode = #tpu.pipeline_mode<synchronous>, transform_indices = @transform_6, window_bounds = array<i64: 1, 128>}, {transform_indices = @transform_7, window_bounds = array<i64: 8, 128>}]} {
    %c0 = arith.constant 0 : index
    %c0_0 = arith.constant 0 : index
    %0 = vector.load %arg1[%c0, %c0_0] : memref<8x32xf32, #tpu.memory_space<vmem>>, vector<8x32xf32>
    %1 = arith.truncf %0 : vector<8x32xf32> to vector<8x32xbf16>
    %c0_1 = arith.constant 0 : index
    %c0_2 = arith.constant 0 : index
    %2 = vector.load %arg2[%c0_1, %c0_2] : memref<32x128xbf16, #tpu.memory_space<vmem>>, vector<32x128xbf16>
    %cst = arith.constant dense<0.000000e+00> : vector<8x128xf32>
    %3 = tpu.matmul %1, %2, %cst {dimension_numbers = #tpu.dot_dimension_numbers<[1], [0], [0], [1], [0, 0, 1, 1], [], []>} : vector<8x32xbf16>, vector<32x128xbf16>, vector<8x128xf32> -> vector<8x128xf32>
    %c0_3 = arith.constant 0 : index
    %c0_4 = arith.constant 0 : index
    %4 = vector.load %arg3[%c0_3, %c0_4] : memref<1x128xf32, #tpu.memory_space<vmem>>, vector<1x128xf32>
    %5 = vector.broadcast %4 : vector<1x128xf32> to vector<8x128xf32>
    %6 = arith.addf %3, %5 : vector<8x128xf32>
    %7 = arith.truncf %6 : vector<8x128xf32> to vector<8x128xbf16>
    %8 = math.tanh %7 : vector<8x128xbf16>
    %c0_5 = arith.constant 0 : index
    %c0_6 = arith.constant 0 : index
    %9 = vector.load %arg4[%c0_5, %c0_6] : memref<128x128xbf16, #tpu.memory_space<vmem>>, vector<128x128xbf16>
    %cst_7 = arith.constant dense<0.000000e+00> : vector<8x128xf32>
    %10 = tpu.matmul %8, %9, %cst_7 {dimension_numbers = #tpu.dot_dimension_numbers<[1], [0], [0], [1], [0, 0, 1, 1], [], []>} : vector<8x128xbf16>, vector<128x128xbf16>, vector<8x128xf32> -> vector<8x128xf32>
    %c0_8 = arith.constant 0 : index
    %c0_9 = arith.constant 0 : index
    %11 = vector.load %arg5[%c0_8, %c0_9] : memref<1x128xf32, #tpu.memory_space<vmem>>, vector<1x128xf32>
    %12 = vector.broadcast %11 : vector<1x128xf32> to vector<8x128xf32>
    %13 = arith.addf %10, %12 : vector<8x128xf32>
    %14 = arith.truncf %13 : vector<8x128xf32> to vector<8x128xbf16>
    %15 = math.tanh %14 : vector<8x128xbf16>
    %c0_10 = arith.constant 0 : index
    %c0_11 = arith.constant 0 : index
    %16 = vector.load %arg6[%c0_10, %c0_11] : memref<128x128xbf16, #tpu.memory_space<vmem>>, vector<128x128xbf16>
    %cst_12 = arith.constant dense<0.000000e+00> : vector<8x128xf32>
    %17 = tpu.matmul %15, %16, %cst_12 {dimension_numbers = #tpu.dot_dimension_numbers<[1], [0], [0], [1], [0, 0, 1, 1], [], []>} : vector<8x128xbf16>, vector<128x128xbf16>, vector<8x128xf32> -> vector<8x128xf32>
    %c0_13 = arith.constant 0 : index
    %c0_14 = arith.constant 0 : index
    %18 = vector.load %arg7[%c0_13, %c0_14] : memref<1x128xf32, #tpu.memory_space<vmem>>, vector<1x128xf32>
    %19 = vector.broadcast %18 : vector<1x128xf32> to vector<8x128xf32>
    %20 = arith.addf %17, %19 : vector<8x128xf32>
    %21 = vector.extract_strided_slice %20 {offsets = [0, 4], sizes = [8, 1], strides = [1, 1]} : vector<8x128xf32> to vector<8x1xf32>
    %22 = arith.negf %21 : vector<8x1xf32>
    %23 = math.exp %22 : vector<8x1xf32>
    %cst_15 = arith.constant 1.000000e+00 : f32
    %24 = vector.broadcast %cst_15 : f32 to vector<8x1xf32>
    %25 = arith.addf %24, %23 : vector<8x1xf32>
    %26 = arith.divf %24, %25 : vector<8x1xf32>
    %cst_16 = arith.constant -2.300000e+00 : f32
    %27 = vector.broadcast %cst_16 : f32 to vector<8x1xf32>
    %28 = arith.mulf %26, %27 : vector<8x1xf32>
    %29 = math.exp %28 : vector<8x1xf32>
    %30 = tpu.iota {dimensions = array<i32: 1>} : vector<8x128xi32>
    %31 = vector.shape_cast %28 : vector<8x1xf32> to vector<8x1xf32>
    %32 = vector.broadcast %31 : vector<8x1xf32> to vector<8x128xf32>
    %33 = vector.shape_cast %29 : vector<8x1xf32> to vector<8x1xf32>
    %34 = vector.broadcast %33 : vector<8x1xf32> to vector<8x128xf32>
    %c4_i32 = arith.constant 4 : i32
    %35 = vector.broadcast %c4_i32 : i32 to vector<8x128xi32>
    %36 = arith.cmpi slt, %30, %35 : vector<8x128xi32>
    %c8_i32 = arith.constant 8 : i32
    %37 = vector.broadcast %c8_i32 : i32 to vector<8x128xi32>
    %38 = arith.cmpi slt, %30, %37 : vector<8x128xi32>
    %39 = arith.select %38, %32, %34 : vector<8x128xi1>, vector<8x128xf32>
    %40 = arith.select %36, %20, %39 : vector<8x128xi1>, vector<8x128xf32>
    %41 = arith.truncf %40 : vector<8x128xf32> to vector<8x128xbf16>
    %c0_17 = arith.constant 0 : index
    %c0_18 = arith.constant 0 : index
    %42 = vector.load %arg8[%c0_17, %c0_18] : memref<8x128xbf16, #tpu.memory_space<vmem>>, vector<8x128xbf16>
    tpu.vector_store %arg8[%c0_17, %c0_18], %41 {strides = array<i32>} : memref<8x128xbf16, #tpu.memory_space<vmem>>, vector<8x128xbf16>,
    return
  }
  func.func @transform_0(%arg0: i32) -> (i32, i32) {
    %c0_i32 = arith.constant 0 : i32
    %c0_i32_0 = arith.constant 0 : i32
    return %arg0, %c0_i32 : i32, i32
  }
  func.func @transform_1(%arg0: i32) -> (i32, i32) {
    %c0_i32 = arith.constant 0 : i32
    %c0_i32_0 = arith.constant 0 : i32
    %c0_i32_1 = arith.constant 0 : i32
    return %c0_i32, %c0_i32_0 : i32, i32
  }
  func.func @transform_2(%arg0: i32) -> (i32, i32) {
    %c0_i32 = arith.constant 0 : i32
    %c0_i32_0 = arith.constant 0 : i32
    %c0_i32_1 = arith.constant 0 : i32
    return %c0_i32, %c0_i32_0 : i32, i32
  }
  func.func @transform_3(%arg0: i32) -> (i32, i32) {
    %c0_i32 = arith.constant 0 : i32
    %c0_i32_0 = arith.constant 0 : i32
    %c0_i32_1 = arith.constant 0 : i32
    return %c0_i32, %c0_i32_0 : i32, i32
  }
  func.func @transform_4(%arg0: i32) -> (i32, i32) {
    %c0_i32 = arith.constant 0 : i32
    %c0_i32_0 = arith.constant 0 : i32
    %c0_i32_1 = arith.constant 0 : i32
    return %c0_i32, %c0_i32_0 : i32, i32
  }
  func.func @transform_5(%arg0: i32) -> (i32, i32) {
    %c0_i32 = arith.constant 0 : i32
    %c0_i32_0 = arith.constant 0 : i32
    %c0_i32_1 = arith.constant 0 : i32
    return %c0_i32, %c0_i32_0 : i32, i32
  }
  func.func @transform_6(%arg0: i32) -> (i32, i32) {
    %c0_i32 = arith.constant 0 : i32
    %c0_i32_0 = arith.constant 0 : i32
    %c0_i32_1 = arith.constant 0 : i32
    return %c0_i32, %c0_i32_0 : i32, i32
  }
  func.func @transform_7(%arg0: i32) -> (i32, i32) {
    %c0_i32 = arith.constant 0 : i32
    %c0_i32_0 = arith.constant 0 : i32
    return %arg0, %c0_i32 : i32, i32
  }
}

</mosaic_0001>

<bundles_post_ra>
// kernel: policy_forward.1
= control target key start
LH: loop header
LB: loop body
LE: loop exit
PB: predicated region body
PF: predicated region fallthrough
CT: control target
= control target key end

     0   :  { %12 = vsyncpa [#allocation3], 0  ;;  %s674_s0 = inlined_call_operand.hbm [shape: f32[8,32], index: 0, kind: input, shape index: {}]   ;;  %s675_s1 = inlined_call_operand.hbm [shape: bf16[32,128], index: 1, kind: input, shape index: {}]   ;;  %s676_s2 = inlined_call_operand.hbm [shape: f32[1,128], index: 2, kind: input, shape index: {}]   ;;  %s677_s3 = inlined_call_operand.hbm [shape: bf16[128,128], index: 3, kind: input, shape index: {}]   ;;  %s678_s4 = inlined_call_operand.vmem [shape: f32[1,128], index: 4, kind: input, shape index: {}]   ;;  %s679_s5 = inlined_call_operand.hbm [shape: bf16[128,128], index: 5, kind: input, shape index: {}]   ;;  %s680_s6 = inlined_call_operand.vmem [shape: f32[1,128], index: 6, kind: input, shape index: {}]   ;;  %s681_s7 = inlined_call_operand.vmem [shape: bf16[8,128], index: 7, kind: output, shape index: {}]  }
   0x1   :  { %13 = vsyncpa [#allocation5], 0  ;;  %s30_s26 = sshll.u32 %s675_s1, 4  ;;  %s31_s26 = int_to_ptr.hbm [resolvable:$true] %s30_s26 }
   0x2   :  { %14 = vsyncpa [#allocation8], 0  ;;  %s602_s27 = smov [#allocation4]   ;;  %s54_s8 = sshll.u32 %s677_s3, 4  ;;  %s55_s8 = int_to_ptr.hbm [resolvable:$true] %s54_s8 }
   0x3   :  { %s32_s28 = sshll.u32 %s602_s27, 4  ;;  %s603_s9 = smov 64   ;;  %s33_s28 = int_to_ptr.vmem [resolvable:$true] %s32_s28 }
   0x4   :  { %s604_s10 = smov 4   ;;  %s605_s11 = smov [#allocation7]  }
   0x5   :  { %38 = dma.hbm_to_vmem [thread:$0]  %s31_s26, 256, %s33_s28, [#allocation5], %s603_s9, %s603_s9, %s604_s10  }
   0x6   :  { %s56_s12 = sshll.u32 %s605_s11, 4  ;;  %s20_s15 = sshll.u32 %s674_s0, 4  ;;  %s57_s12 = int_to_ptr.vmem [resolvable:$true] %s56_s12  ;;  %s21_s15 = int_to_ptr.hbm [resolvable:$true] %s20_s15 }
   0x7   :  { %62 = dma.hbm_to_vmem [thread:$0]  %s55_s8, 1024, %s57_s12, [#allocation8], %s603_s9, %s603_s9, %s604_s10  }
   0x8   :  { %s44_s17 = sshll.u32 %s676_s2, 4  ;;  %s606_s18 = smov [#allocation2]   ;;  %s45_s17 = int_to_ptr.hbm [resolvable:$true] %s44_s17 }
   0x9   :  { %s22_s19 = sshll.u32 %s606_s18, 4  ;;  %s607_s3 = smov [#allocation6]   ;;  %s23_s19 = int_to_ptr.vmem [resolvable:$true] %s22_s19 }
   0xa   :  { %25 = dma.hbm_to_vmem [thread:$0]  %s21_s15, 128, %s23_s19, [#allocation3]  }
   0xb   :  { %s46_s20 = sshll.u32 %s607_s3, 4  ;;  %s69_s23 = sshll.u32 %s679_s5, 4  ;;  %s47_s20 = int_to_ptr.vmem [resolvable:$true] %s46_s20  ;;  %s70_s23 = int_to_ptr.hbm [resolvable:$true] %s69_s23 }
   0xc   :  { %49 = dma.hbm_to_vmem [thread:$0]  %s45_s17, 16, %s47_s20, [#allocation5]  }
   0xd   :  { %s608_s0 = smov [#allocation9]  }
   0xe   :  { %s71_s24 = sshll.u32 %s608_s0, 4  ;;  %s72_s24 = int_to_ptr.vmem [resolvable:$true] %s71_s24 }
   0xf   :  { %77 = dma.hbm_to_vmem [thread:$0]  %s70_s23, 1024, %s72_s24, [#allocation8], %s603_s9, %s603_s9, %s604_s10  }
  0x10   :  { %596 = dma.done.wait [#allocation3], 128  }
  0x11   :  { %597 = vsyncadd [#allocation3], 4294967168 }
  0x12   :  { %598 = dma.done.wait [#allocation5], 272  }
  0x13   :  { %599 = vsyncadd [#allocation5], 4294967024 }
  0x14   :  { %600 = dma.done.wait [#allocation8], 2048  }
  0x15   :  { %601 = vsyncadd [#allocation8], 4294965248  ;;  %v432_v0 = vld [vmem:[#allocation4 + $0x8] sm:$0xff]  ;;  %v431_v2 = vld [vmem:[#allocation4] sm:$0xff]  ;;  %vm123_vm0 = vcmask 261120   ;;  %v609_v36 = vmov 4   ;;  %v332_v58 = vlaneseq }
  0x16   :  { %v440_v1 = vld [vmem:[#allocation7 + $0x38] sm:$0xff]  ;;  %133 = vmatpush.bf16.msra.mxu0 %v432_v0  ;;  %v101_v3 = vld [vmem:[#allocation2] sm:$0xff]  ;;  %v439_v4 = vld [vmem:[#allocation7 + $0x30] sm:$0xff]  ;;  %457 = vset.pattern.permute.xlu0 %v609_v36 }
  0x17   :  { %212 = vmatpush.bf16.msra.mxu1 %v440_v1  ;;  %v102_v5 = vpack.c.bf16 %v101_v3, %v101_v3  ;;  %v438_v6 = vld [vmem:[#allocation7 + $0x28] sm:$0xff]  ;;  %v437_v7 = vld [vmem:[#allocation7 + $0x20] sm:$0xff]  ;;  %v436_v8 = vld [vmem:[#allocation7 + $0x18] sm:$0xff]  ;;  %v333_v59 = vand.u32 127, %v332_v58 }
  0x18   :  { %v435_v9 = vld [vmem:[#allocation7 + $0x10] sm:$0xff]  ;;  %v434_v10 = vld [vmem:[#allocation7 + $0x8] sm:$0xff]  ;;  %v433_v11 = vld [vmem:[#allocation7] sm:$0xff] }
  0x19   :  { %v448_v12 = vld [vmem:[#allocation9 + $0x38] sm:$0xff]  ;;  %v447_v13 = vld [vmem:[#allocation9 + $0x30] sm:$0xff]  ;;  %v446_v14 = vld [vmem:[#allocation9 + $0x28] sm:$0xff]  ;;  %vm345_vm5 = vcmp.lt.s32.totalorder %v333_v59, 8  ;;  %vm344_vm6 = vcmp.lt.s32.totalorder %v333_v59, 4 }
  0x1a   :  { %134 = vmatpush.bf16.msra.mxu0 %v431_v2  ;;  %297 = vmatpush.bf16.msra.mxu2 %v448_v12  ;;  %v445_v15 = vld [vmem:[#allocation9 + $0x20] sm:$0xff]  ;;  %v463_v16 = vld [vmem:[#allocation6] ss:$0 sm:$0xff]  ;;  %v443_v25 = vld [vmem:[#allocation9 + $0x10] sm:$0xff] }
  0x1b   :  { %213 = vmatpush.bf16.msra.mxu1 %v439_v4  ;;  %v444_v24 = vld [vmem:[#allocation9 + $0x18] sm:$0xff]  ;;  %v442_v26 = vld [vmem:[#allocation9 + $0x8] sm:$0xff]  ;;  %v441_v27 = vld [vmem:[#allocation9] sm:$0xff] }
  0x1c   :  { %v464_v28 = vld [vmem:[%s678_s4] ss:$0 sm:$0xff] }
  0x1d   :  { %365 = vmatmul.msk.bf16.vlgmr.msra.gmra.mxu0 %vm123_vm0, %v102_v5  ;;  %v465_v37 = vld [vmem:[%s680_s6] ss:$0 sm:$0xff] }
  0x1e   :  { %298 = vmatpush.bf16.msra.mxu2 %v447_v13 }
  0x1f   :  { %214 = vmatpush.bf16.msra.mxu1 %v438_v6 }
  0x22   :  { %299 = vmatpush.bf16.msra.mxu2 %v446_v14 }
  0x23   :  { %215 = vmatpush.bf16.msra.mxu1 %v437_v7 }
  0x26   :  { %300 = vmatpush.bf16.msra.mxu2 %v445_v15 }
  0x27   :  { %216 = vmatpush.bf16.msra.mxu1 %v436_v8 }
  0x2a   :  { %301 = vmatpush.bf16.msra.mxu2 %v444_v24 }
  0x2b   :  { %217 = vmatpush.bf16.msra.mxu1 %v435_v9 }
  0x2e   :  { %302 = vmatpush.bf16.msra.mxu2 %v443_v25 }
  0x2f   :  { %218 = vmatpush.bf16.msra.mxu1 %v434_v10 }
  0x32   :  { %303 = vmatpush.bf16.msra.mxu2 %v442_v26 }
  0x33   :  { %219 = vmatpush.bf16.msra.mxu1 %v433_v11 }
  0x36   :  { %304 = vmatpush.bf16.msra.mxu2 %v441_v27 }
  0x9a   :  { %v136_v17 = vpop.f32.mrf.mxu0 }
  0x9b   :  { %v137_v18 = vadd.f32 %v463_v16, %v136_v17 }
  0x9d   :  { %v140_v19 = vpack.c.bf16 %v137_v18, %v137_v18 }
  0x9f   :  { %v141_v20 = vunpack.c.l.bf16 %v140_v19 }
  0xa1   :  { %466 = vtanh.f32 %v141_v20 }
  0xa2   :  { %v138_v21 = vpop.f32.mrf.mxu0 }
  0xa7   :  { %v467_v22 = vpop.eup %466 }
  0xa8   :  { %v143_v23 = vpack.c.bf16 %v467_v22, %v467_v22 }
  0xaa   :  { %220 = vmatmul.bf16.vlgmr.msra.gmra.mxu1 %v143_v23 }
 0x127   :  { %v221_v29 = vpop.f32.mrf.mxu1 }
 0x128   :  { %v222_v30 = vadd.f32 %v464_v28, %v221_v29 }
 0x12a   :  { %v225_v31 = vpack.c.bf16 %v222_v30, %v222_v30 }
 0x12c   :  { %v226_v32 = vunpack.c.l.bf16 %v225_v31 }
 0x12e   :  { %468 = vtanh.f32 %v226_v32 }
 0x12f   :  { %v223_v33 = vpop.f32.mrf.mxu1 }
 0x134   :  { %v469_v34 = vpop.eup %468 }
 0x135   :  { %v228_v35 = vpack.c.bf16 %v469_v34, %v469_v34 }
 0x137   :  { %305 = vmatmul.bf16.vlgmr.msra.gmra.mxu2 %v228_v35 }
 0x1ba   :  { %v306_v38 = vpop.f32.mrf.mxu2 }
 0x1bb   :  { %v307_v39 = vadd.f32 %v465_v37, %v306_v38 }
 0x1bd   :  { %v430_v40 = vmul.f32 -1.442695, %v307_v39 }
 0x1bf   :  { %470 = vpow2.f32 %v430_v40 }
 0x1c2   :  { %v308_v41 = vpop.f32.mrf.mxu2 }
 0x1c5   :  { %v471_v42 = vpop.eup %470 }
 0x1c6   :  { %v313_v43 = vadd.f32 1.0, %v471_v42 }
 0x1c8   :  { %472 = vrcp.f32 %v313_v43  ;;  %v325_v47 = vand.u32 2147483648, %v313_v43  ;;  %v323_v49 = vand.u32 2147483647, %v313_v43  ;;  %vm319_vm2 = vweird.f32 %v313_v43 }
 0x1ca   :  { %v326_v51 = vor.u32 1.1754944e-38, %v325_v47  ;;  %vm324_vm4 = vcmp.eq.f32.partialorder %v323_v49, 8.507059e+37 }
 0x1ce   :  { %v473_v44 = vpop.eup %472 }
 0x1cf   :  { %v315_v45 = vmul.f32 %v473_v44, %v313_v43  ;;  %vm320_vm1 = vweird.f32 %v473_v44 }
 0x1d0   :  { %vm321_vm3 = vmor %vm319_vm2, %vm320_vm1 }
 0x1d1   :  { %v316_v46 = vsub.f32 1.0, %v315_v45 }
 0x1d3   :  { %v317_v48 = vmul.f32 %v473_v44, %v316_v46 }
 0x1d5   :  { %v318_v50 = vadd.f32 %v473_v44, %v317_v48 }
 0x1d7   :  { %v322_v52 = vsel %vm321_vm3, %v473_v44, %v318_v50 }
 0x1d8   :  { %v327_v53 = vsel %vm324_vm4, %v326_v51, %v322_v52 }
 0x1d9   :  { %v329_v54 = vmul.f32 -2.3, %v327_v53 }
 0x1db   :  { %v330_v55 = vmul.f32 1.442695, %v329_v54 }
 0x1dd   :  { %474 = vpow2.f32 %v330_v55 }
 0x1e3   :  { %v475_v56 = vpop.eup %474 }
 0x1e4   :  { %v458_v57 = vpack.i.bf16 %v475_v56, %v329_v54 }
 0x1e6   :  { %459 = vperm.xlu0 %457, %v458_v57  }
 0x258   :  { %v460_v60 = vpop.permute.xlu0 %459 }
 0x259   :  { %v462_v61 = vunpack.i.h.bf16 %v460_v60  ;;  %v461_v62 = vunpack.i.l.bf16 %v460_v60 }
 0x25b   :  { %v346_v63 = vsel %vm345_vm5, %v461_v62, %v462_v61 }
 0x25c   :  { %v347_v0 = vsel %vm344_vm6, %v307_v39, %v346_v63 }
 0x25d   :  { %v348_v1 = vpack.c.bf16 %v347_v0, %v347_v0 }
 0x25f   :  { %349 = vst [vmem:[%s681_s7] sm:$0xf] %v348_v1 }
 0x260   :  { %354 = vsyncpa [#allocation3], 1 }
 0x261   :  { %355 = vsyncpa [#allocation5], 1 }
 0x262   :  { %356 = vsyncpa [#allocation8], 1 }

</bundles_post_ra>
